<compile_context>
chip_gen: v6e
topology: v6e:2x2x1
jax: 0.10.0
libtpu: 0.0.40
codegen_flags: <defaults>
</compile_context>

<pallas_src>
import functools
import math

import jax
import jax.numpy as jnp
from jax.experimental import pallas as pl
from jax.experimental.pallas import tpu as pltpu

LANE = 128          # lane width; every logical feature group is padded to one slab
NEG_BIG = -1e30     # log-softmax mask folded into the o2o bias for padded lanes


# ---------------------------------------------------------------------------
# Kernel: one grid step == one RNN timestep. Hidden carried in VMEM scratch.
# ---------------------------------------------------------------------------
def rnn_seq_kernel(x_ref, h0_ref, w1_ref, b1_ref, w2_ref, b2_ref,
                   out_ref, hid_ref, xcat_ref):
    t = pl.program_id(0)

    # Initialize the hidden slab of the concat buffer from the initial hidden.
    @pl.when(t == 0)
    def _():
        xcat_ref[:, LANE:] = h0_ref[...]

    # Refresh the [category | input_t] slab for this timestep (padded to 128).
    xcat_ref[:, :LANE] = x_ref[...]

    # hidden = i2h(cat(...)), output = i2o(cat(...))  -> one fused MXU dot.
    #   y1[:, :128]  = new hidden (real cols 0:H, rest 0)
    #   y1[:, 128:]  = i2o output (real cols 0:O, rest 0)
    y1 = (jnp.dot(xcat_ref[...], w1_ref[...], preferred_element_type=jnp.float32)
          + b1_ref[...])

    # output = o2o(cat(hidden, output))  -> second fused MXU dot.
    out2 = (jnp.dot(y1, w2_ref[...], preferred_element_type=jnp.float32)
            + b2_ref[...])

    # Dropout(p=0.1): eval-mode semantics -> identity.
    # TODO(synk): training-mode dropout (pltpu.prng_seed + prng_random_bits mask)
    # not implemented.

    # LogSoftmax(dim=1), numerically stable. Padded lanes carry a -1e30 bias,
    # so they contribute exp(...) == 0 and do not perturb the real lanes.
    m = jnp.max(out2, axis=1, keepdims=True)
    shifted = out2 - m
    lse = jnp.log(jnp.sum(jnp.exp(shifted), axis=1, keepdims=True))
    out_ref[...] = shifted - lse

    # Carry the new hidden (padded slab, padding stays exactly zero).
    h_new = y1[:, :LANE]
    xcat_ref[:, LANE:] = h_new
    hid_ref[...] = h_new


# ---------------------------------------------------------------------------
# One-time parameter preparation (transpose + concat-split + pad), hoisted out
# of the hot path.  Produces the two fused, lane-dense weight matrices.
# ---------------------------------------------------------------------------
def prepare_params(params, n_cat, input_size, hidden_size, output_size):
    (w_i2h, b_i2h), (w_i2o, b_i2o), (w_o2o, b_o2o) = params
    assert n_cat + input_size <= LANE
    assert hidden_size <= LANE and output_size <= LANE
    ci = n_cat + input_size

    # W1: rows [0:ci] <- category+input weights, rows [128:128+H] <- hidden weights.
    #     cols [0:H]   <- i2h,                  cols [128:128+O]  <- i2o.
    w_i2h_t = w_i2h.T  # (ci + H, H)
    w_i2o_t = w_i2o.T  # (ci + H, O)
    W1 = jnp.zeros((2 * LANE, 2 * LANE), jnp.float32)
    W1 = W1.at[:ci, :hidden_size].set(w_i2h_t[:ci])
    W1 = W1.at[LANE:LANE + hidden_size, :hidden_size].set(w_i2h_t[ci:])
    W1 = W1.at[:ci, LANE:LANE + output_size].set(w_i2o_t[:ci])
    W1 = W1.at[LANE:LANE + hidden_size, LANE:LANE + output_size].set(w_i2o_t[ci:])

    b1 = jnp.zeros((1, 2 * LANE), jnp.float32)
    b1 = b1.at[0, :hidden_size].set(b_i2h)
    b1 = b1.at[0, LANE:LANE + output_size].set(b_i2o)

    # W2: rows [0:H] <- o2o hidden part, rows [128:128+O] <- o2o output part.
    w_o2o_t = w_o2o.T  # (H + O, O)
    W2 = jnp.zeros((2 * LANE, LANE), jnp.float32)
    W2 = W2.at[:hidden_size, :output_size].set(w_o2o_t[:hidden_size])
    W2 = W2.at[LANE:LANE + output_size, :output_size].set(w_o2o_t[hidden_size:])

    # Fold the padded-lane log-softmax mask into the bias (free at runtime).
    b2 = jnp.full((1, LANE), NEG_BIG, jnp.float32)
    b2 = b2.at[0, :output_size].set(b_o2o)

    return W1, b1, W2, b2


# ---------------------------------------------------------------------------
# Fused multi-step forward:  inp_seq is (T, B, input_size).  Runs all T steps
# of the recurrence in one pallas_call.
# ---------------------------------------------------------------------------
@functools.partial(jax.jit, static_argnames=("output_size",))
def rnn_forward_seq(category, inp_seq, hidden0, prepped, *, output_size):
    W1, b1, W2, b2 = prepped
    T, B, input_size = inp_seq.shape
    n_cat = category.shape[1]
    hidden_size = hidden0.shape[1]
    ci = n_cat + input_size

    # Assemble the padded [category | input_t] slab once per sequence (cheap,
    # amortized over all T steps).
    x_seq = jnp.zeros((T, B, LANE), jnp.float32)
    if n_cat > 0:
        x_seq = x_seq.at[:, :, :n_cat].set(category[None, :, :])
    x_seq = x_seq.at[:, :, n_cat:ci].set(inp_seq)

    h0 = jnp.zeros((B, LANE), jnp.float32).at[:, :hidden_size].set(hidden0)

    const = lambda t: (0, 0)
    out_pad, hid_pad = pl.pallas_call(
        rnn_seq_kernel,
        out_shape=(jax.ShapeDtypeStruct((T, B, LANE), jnp.float32),
                   jax.ShapeDtypeStruct((B, LANE), jnp.float32)),
        grid_spec=pltpu.PrefetchScalarGridSpec(
            num_scalar_prefetch=0,
            grid=(T,),
            in_specs=[
                pl.BlockSpec((None, B, LANE), lambda t: (t, 0, 0)),  # per-step x
                pl.BlockSpec((B, LANE), const),                      # h0 (resident)
                pl.BlockSpec((2 * LANE, 2 * LANE), const),           # W1 (resident)
                pl.BlockSpec((1, 2 * LANE), const),                  # b1 (resident)
                pl.BlockSpec((2 * LANE, LANE), const),               # W2 (resident)
                pl.BlockSpec((1, LANE), const),                      # b2 (resident)
            ],
            out_specs=[
                pl.BlockSpec((None, B, LANE), lambda t: (t, 0, 0)),  # per-step logp
                pl.BlockSpec((B, LANE), const),                      # final hidden
            ],
            scratch_shapes=[pltpu.VMEM((B, 2 * LANE), jnp.float32)],  # concat tile
        ),
        compiler_params=pltpu.CompilerParams(
            dimension_semantics=("arbitrary",),   # recurrent time axis
            vmem_limit_bytes=16 * 1024 * 1024,
        ),
    )(x_seq, h0, W1, b1, W2, b2)

    return out_pad[:, :, :output_size], hid_pad[:, :hidden_size]


def rnn_forward(category, inp, hidden, prepped, *, output_size):
    """Single-step forward matching the PyTorch module's signature (T == 1)."""
    out, hid = rnn_forward_seq(category, inp[None], hidden, prepped,
                               output_size=output_size)
    return out[0], hid


# ---------------------------------------------------------------------------
# Parameter init (PyTorch nn.Linear default: U(-1/sqrt(fan_in), +1/sqrt(fan_in)))
# ---------------------------------------------------------------------------
def make_params(key, n_categories, input_size, hidden_size, output_size):
    in1 = n_categories + input_size + hidden_size
    in2 = hidden_size + output_size
    keys = jax.random.split(key, 6)

    def linear(kw, kb, fan_in, fan_out):
        bound = 1.0 / math.sqrt(fan_in)
        w = jax.random.uniform(kw, (fan_out, fan_in), jnp.float32, -bound, bound)
        b = jax.random.uniform(kb, (fan_out,), jnp.float32, -bound, bound)
        return w, b

    w_i2h, b_i2h = linear(keys[0], keys[1], in1, hidden_size)
    w_i2o, b_i2o = linear(keys[2], keys[3], in1, output_size)
    w_o2o, b_o2o = linear(keys[4], keys[5], in2, output_size)
    return (w_i2h, b_i2h), (w_i2o, b_i2o), (w_o2o, b_o2o)


# ---------------------------------------------------------------------------
# Pure-JAX reference (mirrors the PyTorch forward in eval mode, scanned over T)
# ---------------------------------------------------------------------------
def rnn_forward_seq_ref(category, inp_seq, hidden0, params):
    (w_i2h, b_i2h), (w_i2o, b_i2o), (w_o2o, b_o2o) = params

    def step(h, x):
        xc = jnp.concatenate([category, x, h], axis=1)
        h_new = xc @ w_i2h.T + b_i2h
        o1 = xc @ w_i2o.T + b_i2o
        xc2 = jnp.concatenate([h_new, o1], axis=1)
        o2 = xc2 @ w_o2o.T + b_o2o
        return h_new, jax.nn.log_softmax(o2, axis=1)

    h_final, outs = jax.lax.scan(step, hidden0, inp_seq)
    return outs, h_final


if __name__ == "__main__":
    B, n_categories, input_size, hidden_size, output_size, T = 2, 4, 8, 32, 8, 8

    key = jax.random.PRNGKey(0)
    k_cat, k_inp, k_par, k_par0 = jax.random.split(key, 4)
    category = jax.random.normal(k_cat, (B, n_categories), jnp.float32)
    inp_seq = jax.random.normal(k_inp, (T, B, input_size), jnp.float32)
    hidden0 = jnp.zeros((B, hidden_size), jnp.float32)  # initHidden()

    params = make_params(k_par, n_categories, input_size, hidden_size, output_size)
    prepped = prepare_params(params, n_categories, input_size, hidden_size, output_size)

    out, hid = rnn_forward_seq(category, inp_seq, hidden0, prepped,
                               output_size=output_size)
    jax.block_until_ready((out, hid))

    out_ref, hid_ref = rnn_forward_seq_ref(category, inp_seq, hidden0, params)
    assert jnp.allclose(out, out_ref, atol=1e-4, rtol=1e-5)
    assert jnp.allclose(hid, hid_ref, atol=1e-4, rtol=1e-5)

    # Degenerate case of the original file: n_categories == len(all_categories) == 0.
    category0 = jnp.zeros((B, 0), jnp.float32)
    params0 = make_params(k_par0, 0, input_size, hidden_size, output_size)
    prepped0 = prepare_params(params0, 0, input_size, hidden_size, output_size)
    out0, hid0 = rnn_forward_seq(category0, inp_seq, hidden0, prepped0,
                                 output_size=output_size)
    jax.block_until_ready((out0, hid0))
    out0_ref, hid0_ref = rnn_forward_seq_ref(category0, inp_seq, hidden0, params0)
    assert jnp.allclose(out0, out0_ref, atol=1e-4, rtol=1e-5)
    assert jnp.allclose(hid0, hid0_ref, atol=1e-4, rtol=1e-5)

    print("KERNEL_OK")
</pallas_src>

<mosaic_0001>
module attributes {stable_mosaic.version = 11 : i64} {
  func.func @rnn_seq_kernel(%arg0: i32, %arg1: memref<1x2x128xf32, #tpu.memory_space<vmem>>, %arg2: memref<2x128xf32, #tpu.memory_space<vmem>>, %arg3: memref<256x256xf32, #tpu.memory_space<vmem>>, %arg4: memref<1x256xf32, #tpu.memory_space<vmem>>, %arg5: memref<256x128xf32, #tpu.memory_space<vmem>>, %arg6: memref<1x128xf32, #tpu.memory_space<vmem>>, %arg7: memref<1x2x128xf32, #tpu.memory_space<vmem>>, %arg8: memref<2x128xf32, #tpu.memory_space<vmem>>, %arg9: memref<2x256xf32, #tpu.memory_space<vmem>>) attributes {dimension_semantics = [#tpu.dimension_semantics<arbitrary>], iteration_bounds = array<i64: 8>, scalar_prefetch = 0 : i64, scratch_operands = 1 : i64, tpu.core_type = #tpu.core_type<tc>, window_params = [{transform_indices = @transform_0, window_bounds = array<i64: 1, 2, 128>}, {pipeline_mode = #tpu.pipeline_mode<synchronous>, transform_indices = @transform_1, window_bounds = array<i64: 2, 128>}, {pipeline_mode = #tpu.pipeline_mode<synchronous>, transform_indices = @transform_2, window_bounds = array<i64: 256, 256>}, {pipeline_mode = #tpu.pipeline_mode<synchronous>, transform_indices = @transform_3, window_bounds = array<i64: 1, 256>}, {pipeline_mode = #tpu.pipeline_mode<synchronous>, transform_indices = @transform_4, window_bounds = array<i64: 256, 128>}, {pipeline_mode = #tpu.pipeline_mode<synchronous>, transform_indices = @transform_5, window_bounds = array<i64: 1, 128>}, {transform_indices = @transform_6, window_bounds = array<i64: 1, 2, 128>}, {pipeline_mode = #tpu.pipeline_mode<synchronous>, transform_indices = @transform_7, window_bounds = array<i64: 2, 128>}]} {
    %c0_i32 = arith.constant 0 : i32
    %0 = arith.cmpi eq, %arg0, %c0_i32 : i32
    %1 = arith.extui %0 : i1 to i32
    %c0_i32_0 = arith.constant 0 : i32
    %2 = arith.cmpi ne, %1, %c0_i32_0 : i32
    scf.if %2 {
      %c0_24 = arith.constant 0 : index
      %c0_25 = arith.constant 0 : index
      %33 = vector.load %arg2[%c0_24, %c0_25] : memref<2x128xf32, #tpu.memory_space<vmem>>, vector<2x128xf32>
      %c0_26 = arith.constant 0 : index
      %c128_27 = arith.constant 128 : index
      %34 = vector.load %arg9[%c0_26, %c128_27] : memref<2x256xf32, #tpu.memory_space<vmem>>, vector<2x128xf32>
      tpu.vector_store %arg9[%c0_26, %c128_27], %33 {strides = array<i32>} : memref<2x256xf32, #tpu.memory_space<vmem>>, vector<2x128xf32>,
    } else {
    }
    %c0 = arith.constant 0 : index
    %c0_1 = arith.constant 0 : index
    %c0_2 = arith.constant 0 : index
    %3 = vector.load %arg1[%c0, %c0_1, %c0_2] : memref<1x2x128xf32, #tpu.memory_space<vmem>>, vector<1x2x128xf32>
    %4 = vector.shape_cast %3 : vector<1x2x128xf32> to vector<2x128xf32>
    %c0_3 = arith.constant 0 : index
    %c0_4 = arith.constant 0 : index
    %5 = vector.load %arg9[%c0_3, %c0_4] : memref<2x256xf32, #tpu.memory_space<vmem>>, vector<2x128xf32>
    tpu.vector_store %arg9[%c0_3, %c0_4], %4 {strides = array<i32>} : memref<2x256xf32, #tpu.memory_space<vmem>>, vector<2x128xf32>,
    %c0_5 = arith.constant 0 : index
    %c0_6 = arith.constant 0 : index
    %6 = vector.load %arg9[%c0_5, %c0_6] : memref<2x256xf32, #tpu.memory_space<vmem>>, vector<2x256xf32>
    %c0_7 = arith.constant 0 : index
    %c0_8 = arith.constant 0 : index
    %7 = vector.load %arg3[%c0_7, %c0_8] : memref<256x256xf32, #tpu.memory_space<vmem>>, vector<256x256xf32>
    %cst = arith.constant dense<0.000000e+00> : vector<2x256xf32>
    %8 = tpu.matmul %6, %7, %cst {dimension_numbers = #tpu.dot_dimension_numbers<[1], [0], [0], [1], [0, 0, 1, 1], [], []>} : vector<2x256xf32>, vector<256x256xf32>, vector<2x256xf32> -> vector<2x256xf32>
    %c0_9 = arith.constant 0 : index
    %c0_10 = arith.constant 0 : index
    %9 = vector.load %arg4[%c0_9, %c0_10] : memref<1x256xf32, #tpu.memory_space<vmem>>, vector<1x256xf32>
    %10 = vector.broadcast %9 : vector<1x256xf32> to vector<2x256xf32>
    %11 = arith.addf %8, %10 : vector<2x256xf32>
    %c0_11 = arith.constant 0 : index
    %c0_12 = arith.constant 0 : index
    %12 = vector.load %arg5[%c0_11, %c0_12] : memref<256x128xf32, #tpu.memory_space<vmem>>, vector<256x128xf32>
    %cst_13 = arith.constant dense<0.000000e+00> : vector<2x128xf32>
    %13 = tpu.matmul %11, %12, %cst_13 {dimension_numbers = #tpu.dot_dimension_numbers<[1], [0], [0], [1], [0, 0, 1, 1], [], []>} : vector<2x256xf32>, vector<256x128xf32>, vector<2x128xf32> -> vector<2x128xf32>
    %c0_14 = arith.constant 0 : index
    %c0_15 = arith.constant 0 : index
    %14 = vector.load %arg6[%c0_14, %c0_15] : memref<1x128xf32, #tpu.memory_space<vmem>>, vector<1x128xf32>
    %15 = vector.broadcast %14 : vector<1x128xf32> to vector<2x128xf32>
    %16 = arith.addf %13, %15 : vector<2x128xf32>
    %cst_16 = arith.constant dense<0xFF800000> : vector<2xf32>
    %17 = vector.multi_reduction <maximumf>, %16, %cst_16 [1] : vector<2x128xf32> to vector<2xf32>
    %18 = vector.shape_cast %17 : vector<2xf32> to vector<2x1xf32>
    %19 = vector.broadcast %18 : vector<2x1xf32> to vector<2x128xf32>
    %20 = arith.subf %16, %19 : vector<2x128xf32>
    %21 = math.exp %20 : vector<2x128xf32>
    %cst_17 = arith.constant dense<0.000000e+00> : vector<2xf32>
    %22 = vector.multi_reduction <add>, %21, %cst_17 [1] : vector<2x128xf32> to vector<2xf32>
    %23 = vector.shape_cast %22 : vector<2xf32> to vector<2x1xf32>
    %24 = math.log %23 : vector<2x1xf32>
    %25 = vector.broadcast %24 : vector<2x1xf32> to vector<2x128xf32>
    %26 = arith.subf %20, %25 : vector<2x128xf32>
    %c0_18 = arith.constant 0 : index
    %c0_19 = arith.constant 0 : index
    %c0_20 = arith.constant 0 : index
    %27 = vector.load %arg7[%c0_18, %c0_19, %c0_20] : memref<1x2x128xf32, #tpu.memory_space<vmem>>, vector<1x2x128xf32>
    %28 = vector.shape_cast %27 : vector<1x2x128xf32> to vector<2x128xf32>
    %29 = vector.shape_cast %26 : vector<2x128xf32> to vector<1x2x128xf32>
    tpu.vector_store %arg7[%c0_18, %c0_19, %c0_20], %29 {strides = array<i32>} : memref<1x2x128xf32, #tpu.memory_space<vmem>>, vector<1x2x128xf32>,
    %30 = vector.extract_strided_slice %11 {offsets = [0, 0], sizes = [2, 128], strides = [1, 1]} : vector<2x256xf32> to vector<2x128xf32>
    %c0_21 = arith.constant 0 : index
    %c128 = arith.constant 128 : index
    %31 = vector.load %arg9[%c0_21, %c128] : memref<2x256xf32, #tpu.memory_space<vmem>>, vector<2x128xf32>
    tpu.vector_store %arg9[%c0_21, %c128], %30 {strides = array<i32>} : memref<2x256xf32, #tpu.memory_space<vmem>>, vector<2x128xf32>,
    %c0_22 = arith.constant 0 : index
    %c0_23 = arith.constant 0 : index
    %32 = vector.load %arg8[%c0_22, %c0_23] : memref<2x128xf32, #tpu.memory_space<vmem>>, vector<2x128xf32>
    tpu.vector_store %arg8[%c0_22, %c0_23], %30 {strides = array<i32>} : memref<2x128xf32, #tpu.memory_space<vmem>>, vector<2x128xf32>,
    return
  }
  func.func @transform_0(%arg0: i32) -> (i32, i32, i32) {
    %c0_i32 = arith.constant 0 : i32
    %c0_i32_0 = arith.constant 0 : i32
    %c0_i32_1 = arith.constant 0 : i32
    return %arg0, %c0_i32, %c0_i32_0 : i32, i32, i32
  }
  func.func @transform_1(%arg0: i32) -> (i32, i32) {
    %c0_i32 = arith.constant 0 : i32
    %c0_i32_0 = arith.constant 0 : i32
    %c0_i32_1 = arith.constant 0 : i32
    return %c0_i32, %c0_i32_0 : i32, i32
  }
  func.func @transform_2(%arg0: i32) -> (i32, i32) {
    %c0_i32 = arith.constant 0 : i32
    %c0_i32_0 = arith.constant 0 : i32
    %c0_i32_1 = arith.constant 0 : i32
    return %c0_i32, %c0_i32_0 : i32, i32
  }
  func.func @transform_3(%arg0: i32) -> (i32, i32) {
    %c0_i32 = arith.constant 0 : i32
    %c0_i32_0 = arith.constant 0 : i32
    %c0_i32_1 = arith.constant 0 : i32
    return %c0_i32, %c0_i32_0 : i32, i32
  }
  func.func @transform_4(%arg0: i32) -> (i32, i32) {
    %c0_i32 = arith.constant 0 : i32
    %c0_i32_0 = arith.constant 0 : i32
    %c0_i32_1 = arith.constant 0 : i32
    return %c0_i32, %c0_i32_0 : i32, i32
  }
  func.func @transform_5(%arg0: i32) -> (i32, i32) {
    %c0_i32 = arith.constant 0 : i32
    %c0_i32_0 = arith.constant 0 : i32
    %c0_i32_1 = arith.constant 0 : i32
    return %c0_i32, %c0_i32_0 : i32, i32
  }
  func.func @transform_6(%arg0: i32) -> (i32, i32, i32) {
    %c0_i32 = arith.constant 0 : i32
    %c0_i32_0 = arith.constant 0 : i32
    %c0_i32_1 = arith.constant 0 : i32
    return %arg0, %c0_i32, %c0_i32_0 : i32, i32, i32
  }
  func.func @transform_7(%arg0: i32) -> (i32, i32) {
    %c0_i32 = arith.constant 0 : i32
    %c0_i32_0 = arith.constant 0 : i32
    %c0_i32_1 = arith.constant 0 : i32
    return %c0_i32, %c0_i32_0 : i32, i32
  }
}

</mosaic_0001>

<bundles_post_ra>
// kernel: rnn_forward_seq.1
= control target key start
LH: loop header
LB: loop body
LE: loop exit
PB: predicated region body
PF: predicated region fallthrough
CT: control target
= control target key end

     0   :  { %13 = vsyncpa [#allocation4], 0  ;;  %s1211_s0 = inlined_call_operand.vmem [shape: f32[8,2,128], index: 0, kind: input, shape index: {}]   ;;  %s1212_s1 = inlined_call_operand.vmem [shape: f32[2,128], index: 1, kind: input, shape index: {}]   ;;  %s1213_s2 = inlined_call_operand.hbm [shape: f32[256,256], index: 2, kind: input, shape index: {}]   ;;  %s1214_s3 = inlined_call_operand.vmem [shape: f32[1,256], index: 3, kind: input, shape index: {}]   ;;  %s1215_s4 = inlined_call_operand.hbm [shape: f32[256,128], index: 4, kind: input, shape index: {}]   ;;  %s1216_s5 = inlined_call_operand.vmem [shape: f32[1,128], index: 5, kind: input, shape index: {}]   ;;  %s1217_s6 = inlined_call_operand.hbm [shape: f32[8,2,128], index: 6, kind: output, shape index: {0}]   ;;  %s1218_s7 = inlined_call_operand.hbm [shape: f32[2,128], index: 7, kind: output, shape index: {1}]  }
   0x1   :  { %14 = vsyncpa [#allocation7], 0 }
   0x2   :  { %15 = vsyncpa [#allocation5], 0 }
   0x3   :  { %17 = vsyncpa [#allocation5 + $0x1], 0 }
   0x4   :  { %18 = vsyncpa [#allocation10], 0  ;;  %s1039_s24 = smov 0   ;;  %s1041_s25 = smov 0  }
   0x5   :  { %s1043_s26 = smov 0   ;;  %s1045_s27 = smov 0  }
   0x6 LB: > { %s1060_s28 = sadd.s32 4294967295, %s989_s27   ;;  %s712_s29 = sadd.s32 4294967294, %s989_s27   ;;  %s989_s27 = sphi %s1045_s27, %s1238_s27   ;;  %s985_s26 = sphi %s1043_s26, %s1237_s26   ;;  %s981_s25 = sphi %s1041_s25, %s1236_s25   ;;  %s977_s24 = sphi %s1039_s24, %s1235_s24  }
   0x7   : > { %s1064_s30 = sadd.s32 1, %s989_s27   ;;  %s162_s8 = sadd.s32 1, %s985_s26 }
   0x8   : > { %s159_s9 = ssub.s32 %s989_s27, %s1064_s30  ;;  %p172_p0 = scmp.ne.s32.totalorder %s985_s26, %s981_s25 }
   0x9   : > { %p160_p1 = scmp.eq.s32.totalorder %s159_s9, 0  ;;  %p1219_p2 = scmp.eq.s32.totalorder %s1060_s28, 7 }
   0xa   : > { %p178_p3 = scmp.ne.s32.totalorder %s981_s25, %s977_s24  ;;  %p179_p4 = scmp.eq.s32.totalorder %s712_s29, 7 }
   0xb   : > { %s1075_s10 = scalar_select %p160_p1, %s985_s26, %s162_s8  }
   0xc   : > { %p1079_p5 = por %p1219_p2, %p172_p0  ;;  %p1083_p6 = por %p179_p4, %p178_p3 }
   0xd   : > { %p713_p7 = scmp.ge.s32.totalorder %s989_s27, 1  ;;  %p207_p8 = scmp.lt.s32.totalorder %s989_s27, 9 }
   0xe   : > { %s1222_s12 = scalar_select %p1083_p6, 1, 0 }
   0xf   : > { %p1220_p10 = scmp.eq.s32.totalorder %s1060_s28, 0  ;;  %p1091_p11 = pnand %p713_p7, %p207_p8 }
  0x10   : > { %s991_s14 = smov [#allocation3]   ;;  %s992_s17 = smov [#allocation6]  }
  0x11   : > { %s222_s15 = sshll.u32 %s991_s14, 4  ;;  %p780_p12 = pneg %p1091_p11  ;;  %s223_s15 = int_to_ptr.vmem [resolvable:$true] %s222_s15 }
  0x12   : > { %s238_s18 = sshll.u32 %s992_s17, 4  ;;  %s852_s19 = scalar_lea.vmem %s223_s15, 8192  ;;  %s239_s18 = int_to_ptr.vmem [resolvable:$true] %s238_s18 }
  0x13   : > { %p1099_p13 = pnand %p1220_p10, %p780_p12  ;;  %p853_p1 = scmp.ne.s32.totalorder %s223_s15, %s852_s19 }
  0x14   : > { %p860_p7 = scmp.lt.s32.totalorder %s223_s15, %s223_s15  ;;  %p861_p8 = scmp.lt.s32.totalorder %s852_s19, %s852_s19 }
  0x15   : > { %p843_p0 = pneg %p1099_p13 }
  0x16   : > { %p862_p2 = por %p861_p8, %p860_p7 }
  0x17   : > { %p855_p3 = pnand %p853_p1, %p843_p0 }
  0x19   : > { %p856_p4 = pneg %p855_p3 }
  0x1b   : > { %p863_p12 = pnand %p862_p2, %p856_p4 }
  0x1d   : > { %866 = shalt.err (!%p863_p12)
}
  0x1e   : > { %s993_s20 = smov 256   ;;  %s994_s21 = smov 16  }
  0x1f   : > { %783 = dma.hbm_to_vmem [thread:$0]  (!%p1099_p13), %s1213_s2, 8192, %s223_s15, [#allocation4], %s993_s20, %s993_s20, %s994_s21  }
  0x20   : > { %s878_s29 = scalar_lea.vmem %s239_s18, 4096  ;;  %p886_p10 = scmp.lt.s32.totalorder %s239_s18, %s239_s18 }
  0x21   : > { %p879_p9 = scmp.ne.s32.totalorder %s239_s18, %s878_s29  ;;  %p887_p6 = scmp.lt.s32.totalorder %s878_s29, %s878_s29 }
  0x23   : > { %p881_p1 = pnand %p879_p9, %p843_p0  ;;  %p888_p7 = por %p887_p6, %p886_p10 }
  0x25   : > { %p882_p3 = pneg %p881_p1 }
  0x27   : > { %p889_p2 = pnand %p888_p7, %p882_p3 }
  0x29   : > { %892 = shalt.err (!%p889_p2)
}
  0x2a   : > { %s995_s8 = smov 128   ;;  %s996_s9 = smov 8  }
  0x2b   : > { %786 = dma.hbm_to_vmem [thread:$0]  (!%p1099_p13), %s1215_s4, 4096, %s239_s18, [#allocation7], %s995_s8, %s995_s8, %s996_s9  }
  0x2c   : > { %264 = sbr.rel (%p1091_p11) target bundleno = 857 (0x359), region = 44  ;;  %p1225_p4 = scmp.eq.s32.totalorder (!%p1091_p11), %s1060_s28, 0 }
  0x31   : > { %960 = dma.done.wait (%p1225_p4), [#allocation4], 8192   ;;  %p1226_p9 = pmov %p1225_p4 }
  0x32   : > { %p1227_p6 = pmov %p1225_p4 }
  0x33   : > { %962 = vsyncadd (%p1226_p9), [#allocation4], 4294959104 }
  0x34   : > { %964 = dma.done.wait (%p1227_p6), [#allocation7], 4096   ;;  %p1228_p10 = pmov %p1225_p4 }
  0x35   : > { %s294_s15 = sand.u32 1, %s981_s25   ;;  %p299_p13 = scmp.lt.s32.totalorder %s1060_s28, 7 }
  0x36   : > { %966 = vsyncadd (%p1228_p10), [#allocation7], 4294963200  ;;  %s1135_s13 = sshll.u32 %s294_s15, 1  ;;  %p1229_p11 = scmp.ne.s32.totalorder %s1060_s28, 0 }
  0x37   : > { %s300_s16 = scalar_select %p299_p13, %s1060_s28, 7 }
  0x38   : > { %s296_s22 = scalar_lea.vmem [#allocation8], %s1135_s13  ;;  %306 = sbr.rel (%p1229_p11) target bundleno = 63 (0x3f), region = 56 }
  0x39   : > { %s721_s18 = sshll.u32 %s300_s16, 1 }
  0x3a   : > { %s1141_s21 = scalar_lea.vmem %s1211_s0, %s721_s18 }
  0x3d   : > { %v307_v0 = vld [vmem:[%s1212_s1] sm:$0x3] }
  0x3e   : > { %308 = vst [vmem:[#allocation2 + $0x2] sm:$0x3] %v307_v0 }
  0x3f PF: > { %v343_v1 = vld [vmem:[#allocation3 + $0xf8] sm:$0xff]  ;;  %v342_v2 = vld [vmem:[#allocation3 + $0xf0] sm:$0xff]  ;;  %v341_v3 = vld [vmem:[#allocation3 + $0xe8] sm:$0xff]  ;;  %vm579_vm0 = vcmask 1041408   ;;  %s997_s16 = smov [#allocation9]   ;;  %p1230_p8 = scmp.eq.s32.totalorder %s1060_s28, 7 }
  0x40   : > { %399 = vmatprep.subr.mxu0 %v343_v1  ;;  %v340_v4 = vld [vmem:[#allocation3 + $0xe0] sm:$0xff]  ;;  %v339_v5 = vld [vmem:[#allocation3 + $0xd8] sm:$0xff]  ;;  %v338_v6 = vld [vmem:[#allocation3 + $0xd0] sm:$0xff]  ;;  %s620_s18 = sshll.u32 %s997_s16, 4  ;;  %s621_s18 = int_to_ptr.vmem [resolvable:$true] %s620_s18 }
  0x41   : > { %400 = vmatpush1.msra.mxu0 %v342_v2  ;;  %v337_v7 = vld [vmem:[#allocation3 + $0xc8] sm:$0xff]  ;;  %v336_v8 = vld [vmem:[#allocation3 + $0xc0] sm:$0xff]  ;;  %v335_v9 = vld [vmem:[#allocation3 + $0xb8] sm:$0xff]  ;;  %s893_s19 = scalar_lea.vmem %s621_s18, 32  ;;  %p900_p3 = scmp.lt.s32.totalorder %s621_s18, %s621_s18 }
  0x42   : > { %401 = vmatprep.subr.mxu0 %v341_v3  ;;  %v334_v10 = vld [vmem:[#allocation3 + $0xb0] sm:$0xff]  ;;  %v333_v11 = vld [vmem:[#allocation3 + $0xa8] sm:$0xff]  ;;  %v332_v12 = vld [vmem:[#allocation3 + $0xa0] sm:$0xff]  ;;  %p894_p0 = scmp.ne.s32.totalorder %s621_s18, %s893_s19  ;;  %p901_p7 = scmp.lt.s32.totalorder %s893_s19, %s893_s19 }
  0x43   : > { %402 = vmatpush1.msra.mxu0 %v340_v4  ;;  %v331_v13 = vld [vmem:[#allocation3 + $0x98] sm:$0xff]  ;;  %v330_v14 = vld [vmem:[#allocation3 + $0x90] sm:$0xff]  ;;  %v329_v15 = vld [vmem:[#allocation3 + $0x88] sm:$0xff] }
  0x44   : > { %403 = vmatprep.subr.mxu0 %v339_v5  ;;  %v328_v16 = vld [vmem:[#allocation3 + $0x80] sm:$0xff]  ;;  %v327_v17 = vld [vmem:[#allocation3 + $0x78] sm:$0xff]  ;;  %v326_v18 = vld [vmem:[#allocation3 + $0x70] sm:$0xff]  ;;  %p895_p12 = pnand %p894_p0, %p1230_p8  ;;  %p902_p2 = por %p901_p7, %p900_p3 }
  0x45   : > { %404 = vmatpush1.msra.mxu0 %v338_v6  ;;  %v325_v19 = vld [vmem:[#allocation3 + $0x68] sm:$0xff]  ;;  %v324_v20 = vld [vmem:[#allocation3 + $0x60] sm:$0xff]  ;;  %v323_v21 = vld [vmem:[#allocation3 + $0x58] sm:$0xff] }
  0x46   : > { %405 = vmatprep.subr.mxu0 %v337_v7  ;;  %v322_v22 = vld [vmem:[#allocation3 + $0x50] sm:$0xff]  ;;  %v321_v23 = vld [vmem:[#allocation3 + $0x48] sm:$0xff]  ;;  %v320_v24 = vld [vmem:[#allocation3 + $0x40] sm:$0xff]  ;;  %p896_p1 = pneg %p895_p12 }
  0x47   : > { %406 = vmatpush1.msra.mxu0 %v336_v8  ;;  %v319_v25 = vld [vmem:[#allocation3 + $0x38] sm:$0xff]  ;;  %v500_v29 = vld [vmem:[#allocation6 + $0xf0] sm:$0xff]  ;;  %v499_v32 = vld [vmem:[#allocation6 + $0xe8] sm:$0xff] }
  0x48   : > { %407 = vmatprep.subr.mxu0 %v335_v9  ;;  %v309_v26 = vld [vmem:[%s1141_s21] sm:$0x3]  ;;  %v484_v30 = vld [vmem:[#allocation6 + $0x70] sm:$0xff]  ;;  %v317_v33 = vld [vmem:[#allocation3 + $0x28] sm:$0xff]  ;;  %p903_p4 = pnand %p902_p2, %p896_p1 }
  0x49   : > { %408 = vmatpush1.msra.mxu0 %v334_v10  ;;  %v501_v27 = vld [vmem:[#allocation6 + $0xf8] sm:$0xff]  ;;  %310 = vst [vmem:[#allocation2] sm:$0x3] %v309_v26  ;;  %v318_v31 = vld [vmem:[#allocation3 + $0x30] sm:$0xff]  ;;  %v483_v34 = vld [vmem:[#allocation6 + $0x68] sm:$0xff] }
  0x4a   : > { %409 = vmatprep.subr.mxu0 %v333_v11  ;;  %731 = vmatprep.subr.mxu1 %v501_v27  ;;  %v485_v28 = vld [vmem:[#allocation6 + $0x78] sm:$0xff]  ;;  %v316_v35 = vld [vmem:[#allocation3 + $0x20] sm:$0xff]  ;;  %v314_v39 = vld [vmem:[#allocation3 + $0x10] sm:$0xff] }
  0x4b   : > { %410 = vmatpush1.msra.mxu0 %v332_v12  ;;  %732 = vmatpush3.msra.mxu1 %v485_v28  ;;  %v498_v36 = vld [vmem:[#allocation6 + $0xe0] sm:$0xff]  ;;  %v315_v37 = vld [vmem:[#allocation3 + $0x18] sm:$0xff]  ;;  %v313_v41 = vld [vmem:[#allocation3 + $0x8] sm:$0xff] }
  0x4c   : > { %411 = vmatprep.subr.mxu0 %v331_v13  ;;  %733 = vmatprep.subr.mxu1 %v500_v29  ;;  %v482_v38 = vld [vmem:[#allocation6 + $0x60] sm:$0xff]  ;;  %v497_v40 = vld [vmem:[#allocation6 + $0xd8] sm:$0xff]  ;;  %v496_v47 = vld [vmem:[#allocation6 + $0xd0] sm:$0xff] }
  0x4d   : > { %412 = vmatpush1.msra.mxu0 %v330_v14  ;;  %734 = vmatpush3.msra.mxu1 %v484_v30  ;;  %v481_v42 = vld [vmem:[#allocation6 + $0x58] sm:$0xff]  ;;  %v312_v43 = vld [vmem:[#allocation3] sm:$0xff]  ;;  %v374_v48 = vld [vmem:[#allocation3 + $0x1f0] sm:$0xff] }
  0x4e   : > { %413 = vmatprep.subr.mxu0 %v329_v15  ;;  %735 = vmatprep.subr.mxu1 %v499_v32  ;;  %v375_v45 = vld [vmem:[#allocation3 + $0x1f8] sm:$0xff]  ;;  %v480_v49 = vld [vmem:[#allocation6 + $0x50] sm:$0xff]  ;;  %v373_v50 = vld [vmem:[#allocation3 + $0x1e8] sm:$0xff] }
  0x4f   : > { %414 = vmatpush1.msra.mxu0 %v328_v16  ;;  %736 = vmatpush3.msra.mxu1 %v483_v34  ;;  %v495_v51 = vld [vmem:[#allocation6 + $0xc8] sm:$0xff]  ;;  %v372_v52 = vld [vmem:[#allocation3 + $0x1e0] sm:$0xff]  ;;  %v371_v54 = vld [vmem:[#allocation3 + $0x1d8] sm:$0xff] }
  0x50   : > { %415 = vmatprep.subr.mxu0 %v327_v17  ;;  %737 = vmatprep.subr.mxu1 %v498_v36  ;;  %v1150_v44 = vld.sshfl [vmem:[#allocation2] sm:$0x33 pattern:$0x76325410]  ;;  %v479_v53 = vld [vmem:[#allocation6 + $0x48] sm:$0xff]  ;;  %v494_v55 = vld [vmem:[#allocation6 + $0xc0] sm:$0xff]  ;;  %v378_v36 = vlaneseq }
  0x51   : > { %416 = vmatpush1.msra.mxu0 %v326_v18  ;;  %738 = vmatpush3.msra.mxu1 %v482_v38  ;;  %v396_v46 = vcombine.high %v1150_v44, %v1150_v44  ;;  %v370_v56 = vld [vmem:[#allocation3 + $0x1d0] sm:$0xff]  ;;  %v478_v57 = vld [vmem:[#allocation6 + $0x40] sm:$0xff]  ;;  %v369_v58 = vld [vmem:[#allocation3 + $0x1c8] sm:$0xff] }
  0x52   : > { %417 = vmatprep.subr.mxu0 %v325_v19  ;;  %739 = vmatprep.subr.mxu1 %v497_v40  ;;  %v493_v59 = vld [vmem:[#allocation6 + $0xb8] sm:$0xff]  ;;  %v368_v60 = vld [vmem:[#allocation3 + $0x1c0] sm:$0xff]  ;;  %v492_v63 = vld [vmem:[#allocation6 + $0xb0] sm:$0xff] }
  0x53   : > { %418 = vmatpush1.msra.mxu0 %v324_v20  ;;  %740 = vmatpush3.msra.mxu1 %v481_v42  ;;  %v477_v61 = vld [vmem:[#allocation6 + $0x38] sm:$0xff]  ;;  %v366_v0 = vld [vmem:[#allocation3 + $0x1b0] sm:$0xff]  ;;  %v365_v2 = vld [vmem:[#allocation3 + $0x1a8] sm:$0xff] }
  0x54   : > { %419 = vmatprep.subr.mxu0 %v323_v21  ;;  %463 = vmatprep.mubr.f32.mxu0 %v396_v46  ;;  %v367_v62 = vld [vmem:[#allocation3 + $0x1b8] sm:$0xff]  ;;  %v476_v1 = vld [vmem:[#allocation6 + $0x30] sm:$0xff]  ;;  %v491_v3 = vld [vmem:[#allocation6 + $0xa8] sm:$0xff] }
  0x55   : > { %420 = vmatpush1.msra.mxu0 %v322_v22  ;;  %741 = vmatprep.subr.mxu1 %v496_v47  ;;  %v364_v4 = vld [vmem:[#allocation3 + $0x1a0] sm:$0xff]  ;;  %v475_v5 = vld [vmem:[#allocation6 + $0x28] sm:$0xff]  ;;  %v363_v6 = vld [vmem:[#allocation3 + $0x198] sm:$0xff] }
  0x56   : > { %421 = vmatprep.subr.mxu0 %v321_v23  ;;  %742 = vmatpush3.msra.mxu1 %v480_v49  ;;  %v490_v7 = vld [vmem:[#allocation6 + $0xa0] sm:$0xff]  ;;  %v362_v8 = vld [vmem:[#allocation3 + $0x190] sm:$0xff]  ;;  %v361_v10 = vld [vmem:[#allocation3 + $0x188] sm:$0xff] }
  0x57   : > { %422 = vmatpush1.msra.mxu0 %v320_v24  ;;  %743 = vmatprep.subr.mxu1 %v495_v51  ;;  %v474_v9 = vld [vmem:[#allocation6 + $0x20] sm:$0xff]  ;;  %v489_v11 = vld [vmem:[#allocation6 + $0x98] sm:$0xff]  ;;  %v358_v15 = vld [vmem:[#allocation3 + $0x170] sm:$0xff] }
  0x58   : > { %423 = vmatprep.subr.mxu0 %v319_v25  ;;  %744 = vmatpush3.msra.mxu1 %v479_v53  ;;  %v360_v12 = vld [vmem:[#allocation3 + $0x180] sm:$0xff]  ;;  %v473_v13 = vld [vmem:[#allocation6 + $0x18] sm:$0xff]  ;;  %v357_v16 = vld [vmem:[#allocation3 + $0x168] sm:$0xff] }
  0x59   : > { %424 = vmatpush1.msra.mxu0 %v318_v31  ;;  %745 = vmatprep.subr.mxu1 %v494_v55  ;;  %v359_v14 = vld [vmem:[#allocation3 + $0x178] sm:$0xff]  ;;  %v356_v17 = vld [vmem:[#allocation3 + $0x160] sm:$0xff]  ;;  %v354_v19 = vld [vmem:[#allocation3 + $0x150] sm:$0xff] }
  0x5a   : > { %425 = vmatprep.subr.mxu0 %v317_v33  ;;  %746 = vmatpush3.msra.mxu1 %v478_v57  ;;  %v355_v18 = vld [vmem:[#allocation3 + $0x158] sm:$0xff]  ;;  %v353_v20 = vld [vmem:[#allocation3 + $0x148] sm:$0xff]  ;;  %v352_v21 = vld [vmem:[#allocation3 + $0x140] sm:$0xff] }
  0x5b   : > { %426 = vmatpush1.msra.mxu0 %v316_v35  ;;  %747 = vmatprep.subr.mxu1 %v493_v59  ;;  %v351_v22 = vld [vmem:[#allocation3 + $0x138] sm:$0xff]  ;;  %v350_v23 = vld [vmem:[#allocation3 + $0x130] sm:$0xff]  ;;  %v349_v24 = vld [vmem:[#allocation3 + $0x128] sm:$0xff] }
  0x5c   : > { %427 = vmatprep.subr.mxu0 %v315_v37  ;;  %748 = vmatpush3.msra.mxu1 %v477_v61  ;;  %v348_v25 = vld [vmem:[#allocation3 + $0x120] sm:$0xff]  ;;  %v347_v26 = vld [vmem:[#allocation3 + $0x118] sm:$0xff]  ;;  %v346_v27 = vld [vmem:[#allocation3 + $0x110] sm:$0xff]  ;;  %v379_v37 = vshrl.u32 %v378_v36, 7 }
  0x5d   : > { %428 = vmatpush1.msra.mxu0 %v314_v39  ;;  %749 = vmatprep.subr.mxu1 %v492_v63  ;;  %v345_v28 = vld [vmem:[#allocation3 + $0x108] sm:$0xff]  ;;  %v344_v29 = vld [vmem:[#allocation3 + $0x100] sm:$0xff]  ;;  %v488_v30 = vld [vmem:[#allocation6 + $0x90] sm:$0xff] }
  0x5e   : > { %429 = vmatprep.subr.mxu0 %v313_v41  ;;  %750 = vmatpush3.msra.mxu1 %v476_v1  ;;  %v472_v31 = vld [vmem:[#allocation6 + $0x10] sm:$0xff]  ;;  %v487_v32 = vld [vmem:[#allocation6 + $0x88] sm:$0xff]  ;;  %v486_v34 = vld [vmem:[#allocation6 + $0x80] sm:$0xff]  ;;  %v380_v38 = vsub.s32 0, %v379_v37  ;;  %v384_v40 = vsub.s32 1, %v379_v37 }
  0x5f   : > { %430 = vmatpush1.msra.mxu0 %v312_v43  ;;  %751 = vmatprep.subr.mxu1 %v491_v3  ;;  %v471_v33 = vld [vmem:[#allocation6 + $0x8] sm:$0xff]  ;;  %v470_v35 = vld [vmem:[#allocation6] sm:$0xff]  ;;  %v376_v39 = vld [vmem:[%s1214_s3] sm:$0x3] }
  0x60   : > { %431 = vmatprep.subr.mxu0 %v375_v45  ;;  %752 = vmatpush3.msra.mxu1 %v475_v5  ;;  %v381_v41 = vrot.slane %v376_v39, %v380_v38  ;;  %v385_v42 = vrot.slane %v376_v39, %v384_v40  ;;  %v724_v49 = vld [vmem:[%s1216_s5] ss:$0 sm:$0xff] }
  0x61   : > { %432 = vmatpush2.msra.mxu0 %v374_v48  ;;  %753 = vmatprep.subr.mxu1 %v490_v7 }
  0x62   : > { %433 = vmatprep.subr.mxu0 %v373_v50  ;;  %754 = vmatpush3.msra.mxu1 %v474_v9 }
  0x63   : > { %434 = vmatpush2.msra.mxu0 %v372_v52  ;;  %755 = vmatprep.subr.mxu1 %v489_v11 }
  0x64   : > { %435 = vmatprep.subr.mxu0 %v371_v54  ;;  %756 = vmatpush3.msra.mxu1 %v473_v13 }
  0x65   : > { %436 = vmatpush2.msra.mxu0 %v370_v56  ;;  %757 = vmatprep.subr.mxu1 %v488_v30 }
  0x66   : > { %437 = vmatprep.subr.mxu0 %v369_v58  ;;  %758 = vmatpush3.msra.mxu1 %v472_v31 }
  0x67   : > { %438 = vmatpush2.msra.mxu0 %v368_v60  ;;  %759 = vmatprep.subr.mxu1 %v487_v32 }
  0x68   : > { %439 = vmatprep.subr.mxu0 %v367_v62  ;;  %760 = vmatpush3.msra.mxu1 %v471_v33 }
  0x69   : > { %440 = vmatpush2.msra.mxu0 %v366_v0  ;;  %761 = vmatprep.subr.mxu1 %v486_v34 }
  0x6a   : > { %441 = vmatprep.subr.mxu0 %v365_v2  ;;  %762 = vmatpush3.msra.mxu1 %v470_v35 }
  0x6b   : > { %442 = vmatpush2.msra.mxu0 %v364_v4 }
  0x6c   : > { %443 = vmatprep.subr.mxu0 %v363_v6 }
  0x6d   : > { %444 = vmatpush2.msra.mxu0 %v362_v8 }
  0x6e   : > { %445 = vmatprep.subr.mxu0 %v361_v10 }
  0x6f   : > { %446 = vmatpush2.msra.mxu0 %v360_v12 }
  0x70   : > { %447 = vmatprep.subr.mxu0 %v359_v14 }
  0x71   : > { %448 = vmatpush2.msra.mxu0 %v358_v15 }
  0x72   : > { %449 = vmatprep.subr.mxu0 %v357_v16 }
  0x73   : > { %450 = vmatpush2.msra.mxu0 %v356_v17 }
  0x74   : > { %451 = vmatprep.subr.mxu0 %v355_v18 }
  0x75   : > { %452 = vmatpush2.msra.mxu0 %v354_v19 }
  0x76   : > { %453 = vmatprep.subr.mxu0 %v353_v20 }
  0x77   : > { %454 = vmatpush2.msra.mxu0 %v352_v21 }
  0x78   : > { %455 = vmatprep.subr.mxu0 %v351_v22 }
  0x79   : > { %456 = vmatpush2.msra.mxu0 %v350_v23 }
  0x7a   : > { %457 = vmatprep.subr.mxu0 %v349_v24 }
  0x7b   : > { %458 = vmatpush2.msra.mxu0 %v348_v25 }
  0x7c   : > { %459 = vmatprep.subr.mxu0 %v347_v26 }
  0x7d   : > { %460 = vmatpush2.msra.mxu0 %v346_v27 }
  0x7e   : > { %461 = vmatprep.subr.mxu0 %v345_v28 }
  0x7f   : > { %462 = vmatpush2.msra.mxu0 %v344_v29 }
  0x80   : > { %464 = vmatmul.mubr.f32.vlgmr.msra.gmra.mxu0 %v1150_v44 }
 0x140   : > { %v465_v43 = vpop.f32.mrf.mxu0 }
 0x141   : > { %v466_v44 = vadd.f32 %v465_v43, %v381_v41 }
 0x142   : > { %v467_v45 = vpop.f32.mrf.mxu0 }
 0x143   : > { %593 = vst [vmem:[#allocation2 + $0x2] sm:$0x3] %v466_v44  ;;  %594 = vst [vmem:[#allocation9] sm:$0x3] %v466_v44  ;;  %v468_v46 = vadd.f32 %v467_v45, %v385_v42 }
 0x145   : > { %573 = vmatprep.mubr.f32.mxu1 %v468_v46 }
 0x146   : > { %574 = vmatmul.mubr.f32.vlgmr.msra.gmra.mxu1 %v466_v44 }
 0x206   : > { %v763_v47 = vpop.f32.mrf.mxu1 }
 0x208   : > { %v764_v48 = vpop.f32.mrf.mxu1 }
 0x209   : > { %v765_v50 = vadd.f32 %v764_v48, %v763_v47 }
 0x20b   : > { %v576_v51 = vadd.f32 %v765_v50, %v724_v49 }
 0x20d   : > { %v580_v52 = vsel %vm579_vm0, %v576_v51, -inf }
 0x20e   : > { %581 = vmax.xlane.f32.xlu0 %v580_v52 }
 0x297   : > { %v582_v53 = vpop.xlane.xlu0 %581 }
 0x298   : > { %v583_v54 = vsub.f32 %v576_v51, %v582_v53 }
 0x29a   : > { %v584_v55 = vmul.f32 1.442695, %v583_v54 }
 0x29c   : > { %837 = vpow2.f32 %v584_v55 }
 0x2a9   : > { %v838_v56 = vpop.eup %837 }
 0x2aa   : > { %v586_v57 = vsel %vm579_vm0, %v838_v56, 0.0 }
 0x2ab   : > { %587 = vadd.xlane.f32.xlu0 %v586_v57 }
 0x2ac   : > { %906 = shalt.err (!%p903_p4)
}
 0x2ad   : > { %p1231_p9 = pmov %p1230_p8  ;;  %s726_s23 = sshll.u32 %s1060_s28, 5 }
 0x2ae   : > { %s609_s29 = sshll.u32 %s296_s22, 4  ;;  %s607_s14 = scalar_lea.hbm %s1217_s6, %s726_s23  ;;  %s610_s29 = int_to_ptr.vmem [resolvable:$true] %s609_s29 }
 0x2af   : > { %776 = dma.vmem_to_hbm [thread:$0]  (%p1231_p9), %s621_s18, 32, %s1218_s7, [#allocation10]  }
 0x2b0   : > { %s596_s17 = scalar_lea.sflag [#allocation5], %s294_s15  ;;  %s917_s16 = scalar_lea.vmem %s610_s29, 32 }
 0x2b1   : > { %p918_p6 = scmp.ne.s32.totalorder %s610_s29, %s917_s16  ;;  %s998_s18 = smov [#allocation8]  }
 0x2b2   : > { %s921_s19 = sshll.u32 %s998_s18, 4  ;;  %s922_s19 = int_to_ptr.vmem [resolvable:$false] %s921_s19 }
 0x2b3   : > { %p919_p10 = pnand %p918_p6, %p1079_p5  ;;  %s923_s20 = scalar_lea.vmem %s922_s19, 64 }
 0x2b4   : > { %p924_p11 = scmp.lt.s32.totalorder %s610_s29, %s922_s19  ;;  %p925_p0 = scmp.lt.s32.totalorder %s923_s20, %s917_s16 }
 0x2b5   : > { %p920_p13 = pneg %p919_p10 }
 0x2b6   : > { %p926_p8 = por %p925_p0, %p924_p11 }
 0x2b8   : > { %p927_p12 = pnand %p926_p8, %p920_p13 }
 0x334   : > { %v588_v58 = vpop.xlane.xlu0 %587 }
 0x335   : > { %839 = vlog2.f32 %v588_v58 }
 0x342   : > { %v840_v59 = vpop.eup %839 }
 0x343   : > { %v590_v60 = vmul.f32 0.6931472, %v840_v59 }
 0x345   : > { %v591_v61 = vsub.f32 %v583_v54, %v590_v60 }
 0x347   : > { %592 = vst [vmem:[%s296_s22] sm:$0x3] %v591_v61 }
 0x348   : > { %930 = shalt.err (!%p927_p12)
}
 0x349   : > { %s931_s21 = scalar_lea.hbm %s607_s14, 32  ;;  %s935_s22 = scalar_lea.hbm %s1217_s6, 256 }
 0x34a   : > { %p932_p1 = scmp.ne.s32.totalorder %s607_s14, %s931_s21  ;;  %p936_p2 = scmp.lt.s32.totalorder %s607_s14, %s1217_s6 }
 0x34b   : > { %p937_p4 = scmp.lt.s32.totalorder %s935_s22, %s931_s21 }
 0x34c   : > { %p933_p3 = pnand %p932_p1, %p1079_p5 }
 0x34d   : > { %p938_p9 = por %p937_p4, %p936_p2 }
 0x34e   : > { %p934_p7 = pneg %p933_p3 }
 0x350   : > { %p939_p6 = pnand %p938_p9, %p934_p7 }
 0x352   : > { %942 = shalt.err (!%p939_p6)
}
 0x353   : > { %774 = dma.vmem_to_hbm [thread:$0]  (%p1079_p5), %s610_s29, 32, %s607_s14, %s596_s17  }
 0x354   : > { %p1232_p10 = scmp.eq.s32.totalorder %s1060_s28, 7 }
 0x356   : > { %968 = dma.done.wait (%p1232_p10), [#allocation10], 32   ;;  %p1233_p13 = pmov %p1232_p10 }
 0x358   : > { %970 = vsyncadd (%p1233_p13), [#allocation10], 4294967264 }
 0x359 PF: > { %p797_p11 = scmp.ge.s32.totalorder %s989_s27, 2  ;;  %s636_s9 = sand.u32 1, %s977_s24  }
 0x35a   : > { %p1234_p0 = scmp.ne.s32.totalorder %s1222_s12, 0  ;;  %s637_s16 = scalar_lea.sflag [#allocation5], %s636_s9 }
 0x35c   : > { %p788_p8 = pnand %p797_p11, %p1234_p0 }
 0x35e   : > { %p789_p12 = pneg %p788_p8 }
 0x360   : > { %972 = dma.done.wait (%p789_p12), %s637_s16, 32  }
 0x361   : > { %974 = vsyncadd (%p789_p12), %s637_s16, 4294967264  ;;  %p21_p5 = scmp.ge.s32.totalorder %s1064_s30, 10   ;;  %s1235_s24 = smov %s981_s25 }
 0x362   : > { %s1236_s25 = smov %s985_s26  ;;  %s1237_s26 = smov %s1075_s10 }
 0x363   : > { %s1238_s27 = smov %s1064_s30  ;;  %23 = sbr.rel (!%p21_p5) target bundleno = 6 (0x6), region = 100 }
 0x368   :  { %642 = vsyncpa [#allocation4], 1 }
 0x369   :  { %644 = vsyncpa [#allocation4 + $0x1], 1 }
 0x36a   :  { %645 = vsyncpa [#allocation7], 1 }
 0x36b   :  { %646 = vsyncpa [#allocation5], 1 }
 0x36c   :  { %648 = vsyncpa [#allocation5 + $0x1], 1 }
 0x36d   :  { %649 = vsyncpa [#allocation10], 1 }

</bundles_post_ra>
